<compile_context>
chip_gen: v5e
topology: v5e:2x2
jax: 0.10.0
libtpu: 0.0.40
codegen_flags: <defaults>
</compile_context>

<pallas_src>
import functools

import jax
import jax.numpy as jnp
from jax.experimental import pallas as pl
from jax.experimental.pallas import tpu as pltpu

_LANE = 128


def _round_up(x, m):
    return -(-x // m) * m


def _fused_softmax_kernel(x_ref, w_ref, b_ref, o_ref):
    # logits = x @ Wc + bc over the (padded) class axis. Single MXU op,
    # f32 accumulate regardless of the operand dtype.
    logits = jnp.dot(x_ref[...], w_ref[...],
                     preferred_element_type=jnp.float32)
    logits = logits + b_ref[...]                      # (1, Npad) row broadcast
    # Softmax over the last (class) axis. Padded columns carry a -1e30 bias,
    # so exp() underflows to exactly 0 and they never affect max / denom.
    m = jnp.max(logits, axis=-1, keepdims=True)
    e = jnp.exp(logits - m)
    denom = jnp.sum(e, axis=-1, keepdims=True)
    # Exact reciprocal (full-precision divide): one per row, then broadcast
    # multiply. (approx=True EUP vrcp was the source of the previous
    # correctness mismatch and saves nothing measurable here.)
    o_ref[...] = (e * (1.0 / denom)).astype(o_ref.dtype)


@functools.partial(jax.jit, static_argnames=("block_b", "compute_dtype"))
def linear_softmax_ale(x, w, b, attribute, *, block_b=256, compute_dtype=None):
    """softmax((x @ w.T + b) @ attribute, axis=1) via a fused Pallas kernel.

    x:         (B, input_dim)
    w:         (attri_dim, input_dim)   [nn.Linear weight convention]
    b:         (attri_dim,)
    attribute: (attri_dim, n_classes)
    returns    (B, n_classes) float32
    """
    B, input_dim = x.shape
    attri_dim, n_classes = attribute.shape
    del attri_dim  # contracted away by the fusion below

    # ---- Algebraic fusion of the two matmuls (done once, outside the grid) ----
    wc = jnp.dot(w.T, attribute, preferred_element_type=jnp.float32)   # (D, C)
    bc = jnp.dot(b, attribute, preferred_element_type=jnp.float32)     # (C,)

    # ---- Lane-dense class axis: pad C up to a multiple of 128 ----
    n_pad = _round_up(max(n_classes, _LANE), _LANE)
    wc_p = jnp.zeros((input_dim, n_pad), jnp.float32).at[:, :n_classes].set(wc)
    bc_p = jnp.full((1, n_pad), jnp.float32(-1e30)).at[0, :n_classes].set(bc)

    # Optional bf16 operands for the MXU (v6e/v7x); accumulate stays f32.
    x_mm = x.astype(jnp.float32)
    if compute_dtype is not None:
        x_mm = x_mm.astype(compute_dtype)
        wc_p = wc_p.astype(compute_dtype)

    # ---- Tile the batch dimension (sublane-aligned), pad B if needed ----
    tb = min(block_b, _round_up(B, 8))
    b_pad = _round_up(B, tb)
    if b_pad != B:
        x_mm = jnp.pad(x_mm, ((0, b_pad - B), (0, 0)))
    grid = (b_pad // tb,)

    out = pl.pallas_call(
        _fused_softmax_kernel,
        out_shape=jax.ShapeDtypeStruct((b_pad, n_pad), jnp.float32),
        grid_spec=pltpu.PrefetchScalarGridSpec(
            num_scalar_prefetch=0,
            grid=grid,
            in_specs=[
                pl.BlockSpec((tb, input_dim), lambda i: (i, 0)),     # x tile
                pl.BlockSpec((input_dim, n_pad), lambda i: (0, 0)),  # fused W
                pl.BlockSpec((1, n_pad), lambda i: (0, 0)),          # fused bias
            ],
            out_specs=pl.BlockSpec((tb, n_pad), lambda i: (i, 0)),
        ),
        compiler_params=pltpu.CompilerParams(
            dimension_semantics=("parallel",)),   # batch tiles are independent
    )(x_mm, wc_p, bc_p)

    return out[:B, :n_classes]


if __name__ == "__main__":
    # Small shapes consistent with the module's forward.
    B = 8            # batch
    input_dim = 32   # feature dim of x
    attri_dim = 16   # attribute embedding dim (fc output)
    n_classes = 8    # number of classes (columns of `attribute`)

    key = jax.random.PRNGKey(0)
    kx, kw, kb, ka = jax.random.split(key, 4)
    x = jax.random.normal(kx, (B, input_dim), dtype=jnp.float32)
    # nn.Linear(input_dim, attri_dim): weight (attri_dim, input_dim), bias (attri_dim,)
    w = jax.random.normal(kw, (attri_dim, input_dim), dtype=jnp.float32) * 0.1
    b = jax.random.normal(kb, (attri_dim,), dtype=jnp.float32) * 0.1
    attribute = jax.random.normal(ka, (attri_dim, n_classes), dtype=jnp.float32)

    out = linear_softmax_ale(x, w, b, attribute)
    jax.block_until_ready(out)

    # Pure-JAX reference (original un-fused formulation).
    middle = x @ w.T + b
    ref = jax.nn.softmax(middle @ attribute, axis=1)
    assert out.shape == (B, n_classes)
    # Only remaining numeric difference is the (exact-algebra) matmul fusion's
    # f32 reassociation -> differences are ~1e-6; 1e-4 gives ample margin.
    assert jnp.allclose(out, ref, atol=1e-4, rtol=1e-4), "mismatch vs reference"
    # Rows must sum to 1 (padded softmax columns contribute exactly 0).
    assert jnp.allclose(jnp.sum(out, axis=1), jnp.ones((B,)), atol=1e-5)

    print("KERNEL_OK")
</pallas_src>

<mosaic_0001>
module attributes {stable_mosaic.version = 11 : i64} {
  func.func @_fused_softmax_kernel(%arg0: i32, %arg1: memref<8x32xf32, #tpu.memory_space<vmem>>, %arg2: memref<32x128xf32, #tpu.memory_space<vmem>>, %arg3: memref<1x128xf32, #tpu.memory_space<vmem>>, %arg4: memref<8x128xf32, #tpu.memory_space<vmem>>) attributes {dimension_semantics = [#tpu.dimension_semantics<parallel>], iteration_bounds = array<i64: 1>, scalar_prefetch = 0 : i64, scratch_operands = 0 : i64, tpu.core_type = #tpu.core_type<tc>, window_params = [{transform_indices = @transform_0, window_bounds = array<i64: 8, 32>}, {pipeline_mode = #tpu.pipeline_mode<synchronous>, transform_indices = @transform_1, window_bounds = array<i64: 32, 128>}, {pipeline_mode = #tpu.pipeline_mode<synchronous>, transform_indices = @transform_2, window_bounds = array<i64: 1, 128>}, {transform_indices = @transform_3, window_bounds = array<i64: 8, 128>}]} {
    %c0 = arith.constant 0 : index
    %c0_0 = arith.constant 0 : index
    %0 = vector.load %arg1[%c0, %c0_0] : memref<8x32xf32, #tpu.memory_space<vmem>>, vector<8x32xf32>
    %c0_1 = arith.constant 0 : index
    %c0_2 = arith.constant 0 : index
    %1 = vector.load %arg2[%c0_1, %c0_2] : memref<32x128xf32, #tpu.memory_space<vmem>>, vector<32x128xf32>
    %cst = arith.constant dense<0.000000e+00> : vector<8x128xf32>
    %2 = tpu.matmul %0, %1, %cst {dimension_numbers = #tpu.dot_dimension_numbers<[1], [0], [0], [1], [0, 0, 1, 1], [], []>} : vector<8x32xf32>, vector<32x128xf32>, vector<8x128xf32> -> vector<8x128xf32>
    %c0_3 = arith.constant 0 : index
    %c0_4 = arith.constant 0 : index
    %3 = vector.load %arg3[%c0_3, %c0_4] : memref<1x128xf32, #tpu.memory_space<vmem>>, vector<1x128xf32>
    %4 = vector.broadcast %3 : vector<1x128xf32> to vector<8x128xf32>
    %5 = arith.addf %2, %4 : vector<8x128xf32>
    %cst_5 = arith.constant dense<0xFF800000> : vector<8xf32>
    %6 = vector.multi_reduction <maximumf>, %5, %cst_5 [1] : vector<8x128xf32> to vector<8xf32>
    %7 = vector.shape_cast %6 : vector<8xf32> to vector<8x1xf32>
    %8 = vector.broadcast %7 : vector<8x1xf32> to vector<8x128xf32>
    %9 = arith.subf %5, %8 : vector<8x128xf32>
    %10 = math.exp %9 : vector<8x128xf32>
    %cst_6 = arith.constant dense<0.000000e+00> : vector<8xf32>
    %11 = vector.multi_reduction <add>, %10, %cst_6 [1] : vector<8x128xf32> to vector<8xf32>
    %12 = vector.shape_cast %11 : vector<8xf32> to vector<8x1xf32>
    %cst_7 = arith.constant 1.000000e+00 : f32
    %13 = vector.broadcast %cst_7 : f32 to vector<8x1xf32>
    %14 = arith.divf %13, %12 : vector<8x1xf32>
    %15 = vector.broadcast %14 : vector<8x1xf32> to vector<8x128xf32>
    %16 = arith.mulf %10, %15 : vector<8x128xf32>
    %c0_8 = arith.constant 0 : index
    %c0_9 = arith.constant 0 : index
    %17 = vector.load %arg4[%c0_8, %c0_9] : memref<8x128xf32, #tpu.memory_space<vmem>>, vector<8x128xf32>
    tpu.vector_store %arg4[%c0_8, %c0_9], %16 {strides = array<i32>} : memref<8x128xf32, #tpu.memory_space<vmem>>, vector<8x128xf32>,
    return
  }
  func.func @transform_0(%arg0: i32) -> (i32, i32) {
    %c0_i32 = arith.constant 0 : i32
    %c0_i32_0 = arith.constant 0 : i32
    return %arg0, %c0_i32 : i32, i32
  }
  func.func @transform_1(%arg0: i32) -> (i32, i32) {
    %c0_i32 = arith.constant 0 : i32
    %c0_i32_0 = arith.constant 0 : i32
    %c0_i32_1 = arith.constant 0 : i32
    return %c0_i32, %c0_i32_0 : i32, i32
  }
  func.func @transform_2(%arg0: i32) -> (i32, i32) {
    %c0_i32 = arith.constant 0 : i32
    %c0_i32_0 = arith.constant 0 : i32
    %c0_i32_1 = arith.constant 0 : i32
    return %c0_i32, %c0_i32_0 : i32, i32
  }
  func.func @transform_3(%arg0: i32) -> (i32, i32) {
    %c0_i32 = arith.constant 0 : i32
    %c0_i32_0 = arith.constant 0 : i32
    return %arg0, %c0_i32 : i32, i32
  }
}

</mosaic_0001>

<bundles_post_ra>
// kernel: linear_softmax_ale.1
= control target key start
LH: loop header
LB: loop body
LE: loop exit
PB: predicated region body
PF: predicated region fallthrough
CT: control target
= control target key end

     0   :  { %s163_s0 = inlined_call_operand.vmem [shape: f32[8,32], index: 0, kind: input, shape index: {}]   ;;  %s164_s1 = inlined_call_operand.vmem [shape: f32[32,128], index: 1, kind: input, shape index: {}]   ;;  %s165_s2 = inlined_call_operand.vmem [shape: f32[1,128], index: 2, kind: input, shape index: {}]   ;;  %s166_s3 = inlined_call_operand.hbm [shape: f32[8,128], index: 3, kind: output, shape index: {}]  }
   0x1   :  { %v19_v0 = vld [vmem:[%s164_s1 + $0x18] sm:$0xff]  ;;  %v18_v1 = vld [vmem:[%s164_s1 + $0x10] sm:$0xff]  ;;  %v17_v2 = vld [vmem:[%s164_s1 + $0x8] sm:$0xff] }
   0x2   :  { %40 = vmatpush.msra.mxu0 %v19_v0 }
   0x3   :  { %8 = vsyncpa [#allocation3], 0  ;;  %v16_v3 = vld [vmem:[%s164_s1] sm:$0xff]  ;;  %vm24_vm0 = vcmask 261120   ;;  %s79_s25 = sshll.u32 %s166_s3, 4  ;;  %s80_s25 = int_to_ptr.hbm [resolvable:$true] %s79_s25 }
   0x4   :  { %41 = vmatpush.msra.mxu0 %v18_v1  ;;  %v15_v4 = vld [vmem:[%s163_s0] sm:$0xff]  ;;  %s121_s0 = smov [#allocation2]  }
   0x5   :  { %v90_v5 = vld [vmem:[%s165_s2] ss:$0 sm:$0xff]  ;;  %s77_s1 = sshll.u32 %s121_s0, 4  ;;  %s78_s1 = int_to_ptr.vmem [resolvable:$true] %s77_s1 }
   0x6   :  { %42 = vmatpush.msra.mxu0 %v17_v2 }
   0x8   :  { %43 = vmatpush.msra.mxu0 %v16_v3 }
   0x9   :  { %88 = vmatmul.msk.f32.vlgmr.msra.gmra.mxu0 %vm24_vm0, %v15_v4 }
  0x86   :  { %v45_v6 = vpop.f32.mrf.mxu0 }
  0x87   :  { %v46_v7 = vadd.f32 %v90_v5, %v45_v6 }
  0x89   :  { %48 = vmax.xlane.f32.xlu0 %v46_v7 }
  0xfc   :  { %v49_v8 = vpop.xlane.xlu0 %48 }
  0xfd   :  { %v50_v9 = vsub.f32 %v46_v7, %v49_v8 }
  0xff   :  { %v51_v10 = vmul.f32 1.442695, %v50_v9 }
 0x101   :  { %91 = vpow2.f32 %v51_v10 }
 0x107   :  { %v92_v11 = vpop.eup %91 }
 0x108   :  { %53 = vadd.xlane.f32.xlu0 %v92_v11 }
 0x17b   :  { %v54_v12 = vpop.xlane.xlu0 %53 }
 0x17c   :  { %93 = vrcp.f32 %v54_v12  ;;  %v66_v16 = vand.u32 2147483648, %v54_v12  ;;  %v64_v18 = vand.u32 2147483647, %v54_v12  ;;  %vm60_vm2 = vweird.f32 %v54_v12 }
 0x17e   :  { %v67_v20 = vor.u32 1.1754944e-38, %v66_v16  ;;  %vm65_vm4 = vcmp.eq.f32.partialorder %v64_v18, 8.507059e+37 }
 0x182   :  { %v94_v13 = vpop.eup %93 }
 0x183   :  { %v56_v14 = vmul.f32 %v94_v13, %v54_v12  ;;  %vm61_vm1 = vweird.f32 %v94_v13 }
 0x184   :  { %vm62_vm3 = vmor %vm60_vm2, %vm61_vm1 }
 0x185   :  { %v57_v15 = vsub.f32 1.0, %v56_v14 }
 0x187   :  { %v58_v17 = vmul.f32 %v94_v13, %v57_v15 }
 0x189   :  { %v59_v19 = vadd.f32 %v94_v13, %v58_v17 }
 0x18b   :  { %v63_v21 = vsel %vm62_vm3, %v94_v13, %v59_v19 }
 0x18c   :  { %v68_v22 = vsel %vm65_vm4, %v67_v20, %v63_v21 }
 0x18d   :  { %v70_v23 = vmul.f32 %v92_v11, %v68_v22 }
 0x18f   :  { %71 = vst [vmem:[#allocation2] sm:$0xff] %v70_v23 }
 0x190   :  { %82 = dma.vmem_to_hbm [thread:$0]  %s78_s1, 128, %s80_s25, [#allocation3]  }
 0x191   :  { %119 = dma.done.wait [#allocation3], 128  }
 0x192   :  { %120 = vsyncadd [#allocation3], 4294967168 }
 0x193   :  { %87 = vsyncpa [#allocation3], 1 }

</bundles_post_ra>
